<compile_context>
chip_gen: v6e
topology: v6e:2x2x1
jax: 0.10.0
libtpu: 0.0.40
codegen_flags: <defaults>
</compile_context>

<pallas_src>
import functools

import jax
import jax.numpy as jnp
from jax import lax
from jax.experimental import pallas as pl
from jax.experimental.pallas import tpu as pltpu
import numpy as np

_LANE = 128


# -----------------------------------------------------------------------------
# Kernel 1: encoder (Linear) + MLP head for both modalities, one batch tile.
# Output block is (2, TB, Fp): view 0 -> feat1 tile, view 1 -> feat2 tile.
# Weights are resident (constant index_map); grid axis is "parallel".
# -----------------------------------------------------------------------------
def _encode_kernel(
    x1_ref, x2_ref,
    we1_ref, be1_ref, w11_ref, b11_ref, w12_ref, b12_ref,
    we2_ref, be2_ref, w21_ref, b21_ref, w22_ref, b22_ref,
    feats_ref,
    *, op_dtype,
):
    f32 = jnp.float32

    def dense(h, w_ref, b_ref):
        return jnp.dot(h.astype(op_dtype), w_ref[...],
                       preferred_element_type=f32) + b_ref[...]

    # modality 1: encoder Linear -> head (Linear, ReLU, Linear)
    h = dense(x1_ref[...], we1_ref, be1_ref)
    h = jnp.maximum(dense(h, w11_ref, b11_ref), 0.0)
    feats_ref[0] = dense(h, w12_ref, b12_ref).astype(feats_ref.dtype)

    # modality 2
    h = dense(x2_ref[...], we2_ref, be2_ref)
    h = jnp.maximum(dense(h, w21_ref, b21_ref), 0.0)
    feats_ref[1] = dense(h, w22_ref, b22_ref).astype(feats_ref.dtype)


# -----------------------------------------------------------------------------
# Kernel 2: SupConLoss ('all' contrast mode) for one anchor tile.
# Computation is kept in (contrast, anchor) orientation so all per-anchor
# reductions land as lane-dense (1, TA) rows and the output store is unmasked.
#   feats_ref : (N, Fp)  all contrast features (resident); the anchor tile is
#               sliced from it in-kernel with pl.ds (no duplicate DMA stream).
#   clab_ref  : (N, 1)   int32 contrast labels, -1 == padded row (resident)
#   alab_ref  : (1, TA)  int32 anchor labels for this tile
#   out_ref   : (1, TA)  per-anchor loss (0 for padded anchors)
# -----------------------------------------------------------------------------
def _supcon_loss_kernel(
    feats_ref, clab_ref, alab_ref, out_ref,
    *, inv_temp: float, loss_scale: float, tile_a: int,
):
    f32 = jnp.float32
    n = feats_ref.shape[0]
    start = pl.multiple_of(pl.program_id(0) * tile_a, tile_a)

    # Anchor tile sliced from the resident block; temperature pre-scaled on the
    # small (TA, Fp) operand instead of the (N, TA) result.
    anchors = feats_ref[pl.ds(start, tile_a), :] * inv_temp

    # sim[c, a] = <contrast_c, anchor_a> / T   -> (N, TA), lane axis = anchors
    sim = lax.dot_general(
        feats_ref[...], anchors,
        dimension_numbers=(((1,), (1,)), ((), ())),
        preferred_element_type=f32,
    )

    crow = lax.broadcasted_iota(jnp.int32, (n, tile_a), 0)          # contrast idx
    acol = lax.broadcasted_iota(jnp.int32, (n, tile_a), 1) + start  # anchor idx
    not_self = crow != acol

    clab = clab_ref[...]                 # (N, 1)
    alab = alab_ref[...]                 # (1, TA)
    contrast_valid = clab >= 0           # padded batch rows never enter the denom

    # positives: same label, excluding self-contrast (padded contrasts can never
    # match a valid anchor since their label sentinel is negative)
    pos_f = jnp.logical_and(clab == alab, not_self).astype(f32)     # (N, TA)

    # self / padding folded additively into the log-sum-exp (single exp pass);
    # excluding the diagonal from the max cancels exactly in log_prob.
    masked_sim = jnp.where(jnp.logical_and(not_self, contrast_valid), sim, -1e30)
    m = jnp.max(masked_sim, axis=0, keepdims=True)                   # (1, TA)
    log_denom = m + jnp.log(
        jnp.sum(jnp.exp(masked_sim - m), axis=0, keepdims=True))     # (1, TA)

    pos_cnt = jnp.sum(pos_f, axis=0, keepdims=True)                  # (1, TA)
    sum_pos_sim = jnp.sum(pos_f * sim, axis=0, keepdims=True)        # (1, TA)
    # sum(pos*(sim - log_denom)) == sum(pos*sim) - pos_cnt*log_denom
    mean_log_prob_pos = (sum_pos_sim - pos_cnt * log_denom) / jnp.maximum(pos_cnt, 1.0)

    # padded anchors contribute 0 (they are also excluded from the final mean).
    # NOTE: the pos_cnt clamp only ever triggers for padded anchors — every
    # valid anchor has at least its other-view twin as a positive.
    anchor_valid = (alab >= 0).astype(f32)
    out_ref[...] = loss_scale * mean_log_prob_pos * anchor_valid


# -----------------------------------------------------------------------------
# Wrapper
# -----------------------------------------------------------------------------
def _round_up(v, m):
    return (v + m - 1) // m * m


def _pad2(a, rows, cols):
    return jnp.pad(a, ((0, rows - a.shape[0]), (0, cols - a.shape[1])))


def supcon_forward(x1, x2, y, params, *, temperature, base_temperature=0.07,
                   use_label=False, max_batch_tile=128, max_anchor_tile=128,
                   use_bf16=False, single_buffer_residents=False):
    """Equivalent of SupConModel.forward(x1, x2, y) -> scalar loss.

    max_batch_tile / max_anchor_tile: 128 is a good default on all generations
    (fills the v5e MXU; on v6e/v7x 256 can be passed if B allows).
    use_bf16: cast MXU operands to bf16 (f32 accumulation) — ~2-4x MXU
    throughput, loosens the f32-reference match.
    single_buffer_residents: use pl.Buffered(1) on constant-index resident
    blocks (v7x VMEM-budget option; residents never change so single buffering
    is free).
    """
    B, D1 = x1.shape
    _, D2 = x2.shape
    H1 = params["we1"].shape[1]
    H2 = params["we2"].shape[1]
    F1 = params["w12"].shape[1]
    F2 = params["w22"].shape[1]
    if F1 != F2:
        raise ValueError("feat_dims of the two heads must match for SupConLoss")
    F = F1

    op_dtype = jnp.bfloat16 if use_bf16 else jnp.float32
    feat_dtype = op_dtype

    # ---- tile selection (small batches -> one round_up(B,8) tile, no waste) ----
    b8 = _round_up(B, 8)
    tile_b = b8 if b8 <= max_batch_tile else max_batch_tile
    Bp = _round_up(B, tile_b)          # multiple of tile_b (and of 8)
    N = 2 * Bp
    if N <= 2 * max_batch_tile:
        tile_a = N                     # single anchor tile
    else:
        tile_a = max_anchor_tile       # N is a multiple of 2*max_batch_tile here
    assert Bp % tile_b == 0 and N % tile_a == 0

    # lane-align every matmul dim (zero padding is exact-result-preserving)
    D1p, D2p = _round_up(D1, _LANE), _round_up(D2, _LANE)
    H1p, H2p = _round_up(H1, _LANE), _round_up(H2, _LANE)
    Fp = _round_up(F, _LANE)

    x1p = _pad2(x1, Bp, D1p).astype(op_dtype)
    x2p = _pad2(x2, Bp, D2p).astype(op_dtype)
    we1p, be1p = _pad2(params["we1"], D1p, H1p).astype(op_dtype), _pad2(params["be1"], 1, H1p)
    w11p, b11p = _pad2(params["w11"], H1p, H1p).astype(op_dtype), _pad2(params["b11"], 1, H1p)
    w12p, b12p = _pad2(params["w12"], H1p, Fp).astype(op_dtype), _pad2(params["b12"], 1, Fp)
    we2p, be2p = _pad2(params["we2"], D2p, H2p).astype(op_dtype), _pad2(params["be2"], 1, H2p)
    w21p, b21p = _pad2(params["w21"], H2p, H2p).astype(op_dtype), _pad2(params["b21"], 1, H2p)
    w22p, b22p = _pad2(params["w22"], H2p, Fp).astype(op_dtype), _pad2(params["b22"], 1, Fp)

    # labels for the positive mask (eye-mask case == arange labels); padded
    # batch rows get a -1 sentinel => excluded from denominator, positives and
    # the final mean.
    lab = y.astype(jnp.int32) if use_label else jnp.arange(B, dtype=jnp.int32)
    if Bp > B:
        lab = jnp.concatenate([lab, jnp.full((Bp - B,), -1, jnp.int32)])
    lab2 = jnp.concatenate([lab, lab])                    # (N,)
    lab_col = lab2[:, None]                               # (N, 1) int32
    lab_row = lab2[None, :]                               # (1, N) int32

    def _res(shape):
        if single_buffer_residents:
            # Resident block never changes -> single buffering halves its VMEM
            # footprint (v7x: 64 MiB physical).
            return pl.BlockSpec(shape, lambda i: (0, 0), pipeline_mode=pl.Buffered(1))
        return pl.BlockSpec(shape, lambda i: (0, 0))

    cparams = pltpu.CompilerParams(
        dimension_semantics=("parallel",),
        vmem_limit_bytes=64 * 1024 * 1024,
    )

    # ---- stage 1: features for both views, grid over batch tiles ----
    # TODO(synk): on v7x, a leading size-2 "view" parallel axis would keep both
    # TensorCores busy when Bp // tile_b == 1.
    enc_kernel = functools.partial(_encode_kernel, op_dtype=op_dtype)
    feats = pl.pallas_call(
        enc_kernel,
        out_shape=jax.ShapeDtypeStruct((2, Bp, Fp), feat_dtype),
        grid_spec=pltpu.PrefetchScalarGridSpec(
            num_scalar_prefetch=0,
            grid=(Bp // tile_b,),
            in_specs=[
                pl.BlockSpec((tile_b, D1p), lambda i: (i, 0)),
                pl.BlockSpec((tile_b, D2p), lambda i: (i, 0)),
                _res((D1p, H1p)), _res((1, H1p)),
                _res((H1p, H1p)), _res((1, H1p)),
                _res((H1p, Fp)), _res((1, Fp)),
                _res((D2p, H2p)), _res((1, H2p)),
                _res((H2p, H2p)), _res((1, H2p)),
                _res((H2p, Fp)), _res((1, Fp)),
            ],
            out_specs=pl.BlockSpec((2, tile_b, Fp), lambda i: (0, i, 0)),
        ),
        compiler_params=cparams,
    )(x1p, x2p,
      we1p, be1p, w11p, b11p, w12p, b12p,
      we2p, be2p, w21p, b21p, w22p, b22p)

    # (2, Bp, Fp) is contiguous [feat1; feat2] -> free reshape, no transpose/concat
    feats2 = feats.reshape(N, Fp)

    # ---- stage 2: SupCon loss, grid over anchor tiles ----
    inv_temp = 1.0 / float(temperature)
    loss_scale = -(float(temperature) / float(base_temperature))
    loss_kernel = functools.partial(
        _supcon_loss_kernel,
        inv_temp=inv_temp, loss_scale=loss_scale, tile_a=tile_a,
    )

    per_anchor = pl.pallas_call(
        loss_kernel,
        out_shape=jax.ShapeDtypeStruct((1, N), jnp.float32),
        grid_spec=pltpu.PrefetchScalarGridSpec(
            num_scalar_prefetch=0,
            grid=(N // tile_a,),
            in_specs=[
                _res((N, Fp)),                               # all contrasts (resident)
                _res((N, 1)),                                # contrast labels (resident)
                pl.BlockSpec((1, tile_a), lambda a: (0, a)),  # anchor labels tile
            ],
            out_specs=pl.BlockSpec((1, tile_a), lambda a: (0, a)),
        ),
        compiler_params=cparams,
    )(feats2, lab_col, lab_row)

    # padded anchors contribute 0; mean over the 2*B real anchors.
    return jnp.sum(per_anchor) / (2.0 * B)


# -----------------------------------------------------------------------------
# Pure-JAX reference (mirrors the PyTorch SupConModel/SupConLoss semantics)
# -----------------------------------------------------------------------------
def supcon_reference(x1, x2, y, params, *, temperature, base_temperature=0.07,
                     use_label=False):
    def enc_head(x, we, be, w1, b1, w2, b2):
        h = x @ we + be
        h = jnp.maximum(h @ w1 + b1, 0.0)
        return h @ w2 + b2

    f1 = enc_head(x1, params["we1"], params["be1"], params["w11"],
                  params["b11"], params["w12"], params["b12"])
    f2 = enc_head(x2, params["we2"], params["be2"], params["w21"],
                  params["b21"], params["w22"], params["b22"])
    B = x1.shape[0]
    feats = jnp.concatenate([f1, f2], axis=0)
    sim = feats @ feats.T / temperature
    logits = sim - jnp.max(sim, axis=1, keepdims=True)
    n = 2 * B
    logits_mask = 1.0 - jnp.eye(n, dtype=jnp.float32)
    if use_label:
        base = (y[:, None] == y[None, :]).astype(jnp.float32)
    else:
        base = jnp.eye(B, dtype=jnp.float32)
    mask = jnp.tile(base, (2, 2)) * logits_mask
    exp_logits = jnp.exp(logits) * logits_mask
    log_prob = logits - jnp.log(jnp.sum(exp_logits, axis=1, keepdims=True))
    mlpp = jnp.sum(mask * log_prob, axis=1) / jnp.sum(mask, axis=1)
    return jnp.mean(-(temperature / base_temperature) * mlpp)


# -----------------------------------------------------------------------------
# Deterministic parameter construction (PyTorch Linear (out,in) stored as
# (in,out) so the kernel computes x @ W + b).
# -----------------------------------------------------------------------------
def make_params(key, d1_in, d2_in, dim_ins, feat_dims):
    keys = jax.random.split(key, 12)
    scale = 0.1

    def lin(k, din, dout):
        return scale * jax.random.normal(k, (din, dout), jnp.float32)

    return {
        "we1": lin(keys[0], d1_in, dim_ins[0]),
        "be1": scale * jax.random.normal(keys[1], (1, dim_ins[0]), jnp.float32),
        "w11": lin(keys[2], dim_ins[0], dim_ins[0]),
        "b11": scale * jax.random.normal(keys[3], (1, dim_ins[0]), jnp.float32),
        "w12": lin(keys[4], dim_ins[0], feat_dims[0]),
        "b12": scale * jax.random.normal(keys[5], (1, feat_dims[0]), jnp.float32),
        "we2": lin(keys[6], d2_in, dim_ins[1]),
        "be2": scale * jax.random.normal(keys[7], (1, dim_ins[1]), jnp.float32),
        "w21": lin(keys[8], dim_ins[1], dim_ins[1]),
        "b21": scale * jax.random.normal(keys[9], (1, dim_ins[1]), jnp.float32),
        "w22": lin(keys[10], dim_ins[1], feat_dims[1]),
        "b22": scale * jax.random.normal(keys[11], (1, feat_dims[1]), jnp.float32),
    }


if __name__ == "__main__":
    B = 16                 # batch
    D1_IN, D2_IN = 12, 20  # raw input dims of the two modalities
    DIM_INS = (32, 48)     # encoder output dims / head hidden dims
    FEAT_DIMS = (16, 16)   # projection dims (must match across views)
    TEMPERATURE = 0.1

    key = jax.random.PRNGKey(0)
    k_x1, k_x2, k_y, k_p = jax.random.split(key, 4)

    x1 = jax.random.normal(k_x1, (B, D1_IN), jnp.float32)
    x2 = jax.random.normal(k_x2, (B, D2_IN), jnp.float32)
    y = jax.random.randint(k_y, (B,), 0, 4, jnp.int32)
    params = make_params(k_p, D1_IN, D2_IN, DIM_INS, FEAT_DIMS)

    # default SupConModel path (mask = eye(batch))
    loss = supcon_forward(x1, x2, y, params, temperature=TEMPERATURE,
                          use_label=False)
    loss = jax.block_until_ready(loss)
    ref = supcon_reference(x1, x2, y, params, temperature=TEMPERATURE,
                           use_label=False)
    np.testing.assert_allclose(np.asarray(loss), np.asarray(ref),
                               rtol=1e-4, atol=1e-4)

    # label-supervised path with a batch that is NOT a multiple of 8
    # (exercises the row-padding / -1 sentinel masking).
    Bs = 10
    x1s, x2s, ys = x1[:Bs], x2[:Bs], y[:Bs]
    loss2 = supcon_forward(x1s, x2s, ys, params, temperature=TEMPERATURE,
                           use_label=True)
    loss2 = jax.block_until_ready(loss2)
    ref2 = supcon_reference(x1s, x2s, ys, params, temperature=TEMPERATURE,
                            use_label=True)
    np.testing.assert_allclose(np.asarray(loss2), np.asarray(ref2),
                               rtol=1e-4, atol=1e-4)

    print("KERNEL_OK")
</pallas_src>

<mosaic_0001>
module attributes {stable_mosaic.version = 11 : i64} {
  func.func @_encode_kernel(%arg0: i32, %arg1: memref<16x128xf32, #tpu.memory_space<vmem>>, %arg2: memref<16x128xf32, #tpu.memory_space<vmem>>, %arg3: memref<128x128xf32, #tpu.memory_space<vmem>>, %arg4: memref<1x128xf32, #tpu.memory_space<vmem>>, %arg5: memref<128x128xf32, #tpu.memory_space<vmem>>, %arg6: memref<1x128xf32, #tpu.memory_space<vmem>>, %arg7: memref<128x128xf32, #tpu.memory_space<vmem>>, %arg8: memref<1x128xf32, #tpu.memory_space<vmem>>, %arg9: memref<128x128xf32, #tpu.memory_space<vmem>>, %arg10: memref<1x128xf32, #tpu.memory_space<vmem>>, %arg11: memref<128x128xf32, #tpu.memory_space<vmem>>, %arg12: memref<1x128xf32, #tpu.memory_space<vmem>>, %arg13: memref<128x128xf32, #tpu.memory_space<vmem>>, %arg14: memref<1x128xf32, #tpu.memory_space<vmem>>, %arg15: memref<2x16x128xf32, #tpu.memory_space<vmem>>) attributes {dimension_semantics = [#tpu.dimension_semantics<parallel>], iteration_bounds = array<i64: 1>, scalar_prefetch = 0 : i64, scratch_operands = 0 : i64, tpu.core_type = #tpu.core_type<tc>, window_params = [{transform_indices = @transform_0, window_bounds = array<i64: 16, 128>}, {transform_indices = @transform_1, window_bounds = array<i64: 16, 128>}, {pipeline_mode = #tpu.pipeline_mode<synchronous>, transform_indices = @transform_2, window_bounds = array<i64: 128, 128>}, {pipeline_mode = #tpu.pipeline_mode<synchronous>, transform_indices = @transform_3, window_bounds = array<i64: 1, 128>}, {pipeline_mode = #tpu.pipeline_mode<synchronous>, transform_indices = @transform_4, window_bounds = array<i64: 128, 128>}, {pipeline_mode = #tpu.pipeline_mode<synchronous>, transform_indices = @transform_5, window_bounds = array<i64: 1, 128>}, {pipeline_mode = #tpu.pipeline_mode<synchronous>, transform_indices = @transform_6, window_bounds = array<i64: 128, 128>}, {pipeline_mode = #tpu.pipeline_mode<synchronous>, transform_indices = @transform_7, window_bounds = array<i64: 1, 128>}, {pipeline_mode = #tpu.pipeline_mode<synchronous>, transform_indices = @transform_8, window_bounds = array<i64: 128, 128>}, {pipeline_mode = #tpu.pipeline_mode<synchronous>, transform_indices = @transform_9, window_bounds = array<i64: 1, 128>}, {pipeline_mode = #tpu.pipeline_mode<synchronous>, transform_indices = @transform_10, window_bounds = array<i64: 128, 128>}, {pipeline_mode = #tpu.pipeline_mode<synchronous>, transform_indices = @transform_11, window_bounds = array<i64: 1, 128>}, {pipeline_mode = #tpu.pipeline_mode<synchronous>, transform_indices = @transform_12, window_bounds = array<i64: 128, 128>}, {pipeline_mode = #tpu.pipeline_mode<synchronous>, transform_indices = @transform_13, window_bounds = array<i64: 1, 128>}, {transform_indices = @transform_14, window_bounds = array<i64: 2, 16, 128>}]} {
    %c0 = arith.constant 0 : index
    %c0_0 = arith.constant 0 : index
    %0 = vector.load %arg1[%c0, %c0_0] : memref<16x128xf32, #tpu.memory_space<vmem>>, vector<16x128xf32>
    %c0_1 = arith.constant 0 : index
    %c0_2 = arith.constant 0 : index
    %1 = vector.load %arg3[%c0_1, %c0_2] : memref<128x128xf32, #tpu.memory_space<vmem>>, vector<128x128xf32>
    %cst = arith.constant dense<0.000000e+00> : vector<16x128xf32>
    %2 = tpu.matmul %0, %1, %cst {dimension_numbers = #tpu.dot_dimension_numbers<[1], [0], [0], [1], [0, 0, 1, 1], [], []>} : vector<16x128xf32>, vector<128x128xf32>, vector<16x128xf32> -> vector<16x128xf32>
    %c0_3 = arith.constant 0 : index
    %c0_4 = arith.constant 0 : index
    %3 = vector.load %arg4[%c0_3, %c0_4] : memref<1x128xf32, #tpu.memory_space<vmem>>, vector<1x128xf32>
    %4 = vector.broadcast %3 : vector<1x128xf32> to vector<16x128xf32>
    %5 = arith.addf %2, %4 : vector<16x128xf32>
    %c0_5 = arith.constant 0 : index
    %c0_6 = arith.constant 0 : index
    %6 = vector.load %arg5[%c0_5, %c0_6] : memref<128x128xf32, #tpu.memory_space<vmem>>, vector<128x128xf32>
    %cst_7 = arith.constant dense<0.000000e+00> : vector<16x128xf32>
    %7 = tpu.matmul %5, %6, %cst_7 {dimension_numbers = #tpu.dot_dimension_numbers<[1], [0], [0], [1], [0, 0, 1, 1], [], []>} : vector<16x128xf32>, vector<128x128xf32>, vector<16x128xf32> -> vector<16x128xf32>
    %c0_8 = arith.constant 0 : index
    %c0_9 = arith.constant 0 : index
    %8 = vector.load %arg6[%c0_8, %c0_9] : memref<1x128xf32, #tpu.memory_space<vmem>>, vector<1x128xf32>
    %9 = vector.broadcast %8 : vector<1x128xf32> to vector<16x128xf32>
    %10 = arith.addf %7, %9 : vector<16x128xf32>
    %cst_10 = arith.constant 0.000000e+00 : f32
    %11 = vector.broadcast %cst_10 : f32 to vector<16x128xf32>
    %12 = arith.maximumf %10, %11 : vector<16x128xf32>
    %c0_11 = arith.constant 0 : index
    %c0_12 = arith.constant 0 : index
    %13 = vector.load %arg7[%c0_11, %c0_12] : memref<128x128xf32, #tpu.memory_space<vmem>>, vector<128x128xf32>
    %cst_13 = arith.constant dense<0.000000e+00> : vector<16x128xf32>
    %14 = tpu.matmul %12, %13, %cst_13 {dimension_numbers = #tpu.dot_dimension_numbers<[1], [0], [0], [1], [0, 0, 1, 1], [], []>} : vector<16x128xf32>, vector<128x128xf32>, vector<16x128xf32> -> vector<16x128xf32>
    %c0_14 = arith.constant 0 : index
    %c0_15 = arith.constant 0 : index
    %15 = vector.load %arg8[%c0_14, %c0_15] : memref<1x128xf32, #tpu.memory_space<vmem>>, vector<1x128xf32>
    %16 = vector.broadcast %15 : vector<1x128xf32> to vector<16x128xf32>
    %17 = arith.addf %14, %16 : vector<16x128xf32>
    %c0_16 = arith.constant 0 : index
    %c0_17 = arith.constant 0 : index
    %c0_18 = arith.constant 0 : index
    %18 = vector.load %arg15[%c0_16, %c0_17, %c0_18] : memref<2x16x128xf32, #tpu.memory_space<vmem>>, vector<1x16x128xf32>
    %19 = vector.shape_cast %18 : vector<1x16x128xf32> to vector<16x128xf32>
    %20 = vector.shape_cast %17 : vector<16x128xf32> to vector<1x16x128xf32>
    tpu.vector_store %arg15[%c0_16, %c0_17, %c0_18], %20 {strides = array<i32>} : memref<2x16x128xf32, #tpu.memory_space<vmem>>, vector<1x16x128xf32>,
    %c0_19 = arith.constant 0 : index
    %c0_20 = arith.constant 0 : index
    %21 = vector.load %arg2[%c0_19, %c0_20] : memref<16x128xf32, #tpu.memory_space<vmem>>, vector<16x128xf32>
    %c0_21 = arith.constant 0 : index
    %c0_22 = arith.constant 0 : index
    %22 = vector.load %arg9[%c0_21, %c0_22] : memref<128x128xf32, #tpu.memory_space<vmem>>, vector<128x128xf32>
    %cst_23 = arith.constant dense<0.000000e+00> : vector<16x128xf32>
    %23 = tpu.matmul %21, %22, %cst_23 {dimension_numbers = #tpu.dot_dimension_numbers<[1], [0], [0], [1], [0, 0, 1, 1], [], []>} : vector<16x128xf32>, vector<128x128xf32>, vector<16x128xf32> -> vector<16x128xf32>
    %c0_24 = arith.constant 0 : index
    %c0_25 = arith.constant 0 : index
    %24 = vector.load %arg10[%c0_24, %c0_25] : memref<1x128xf32, #tpu.memory_space<vmem>>, vector<1x128xf32>
    %25 = vector.broadcast %24 : vector<1x128xf32> to vector<16x128xf32>
    %26 = arith.addf %23, %25 : vector<16x128xf32>
    %c0_26 = arith.constant 0 : index
    %c0_27 = arith.constant 0 : index
    %27 = vector.load %arg11[%c0_26, %c0_27] : memref<128x128xf32, #tpu.memory_space<vmem>>, vector<128x128xf32>
    %cst_28 = arith.constant dense<0.000000e+00> : vector<16x128xf32>
    %28 = tpu.matmul %26, %27, %cst_28 {dimension_numbers = #tpu.dot_dimension_numbers<[1], [0], [0], [1], [0, 0, 1, 1], [], []>} : vector<16x128xf32>, vector<128x128xf32>, vector<16x128xf32> -> vector<16x128xf32>
    %c0_29 = arith.constant 0 : index
    %c0_30 = arith.constant 0 : index
    %29 = vector.load %arg12[%c0_29, %c0_30] : memref<1x128xf32, #tpu.memory_space<vmem>>, vector<1x128xf32>
    %30 = vector.broadcast %29 : vector<1x128xf32> to vector<16x128xf32>
    %31 = arith.addf %28, %30 : vector<16x128xf32>
    %cst_31 = arith.constant 0.000000e+00 : f32
    %32 = vector.broadcast %cst_31 : f32 to vector<16x128xf32>
    %33 = arith.maximumf %31, %32 : vector<16x128xf32>
    %c0_32 = arith.constant 0 : index
    %c0_33 = arith.constant 0 : index
    %34 = vector.load %arg13[%c0_32, %c0_33] : memref<128x128xf32, #tpu.memory_space<vmem>>, vector<128x128xf32>
    %cst_34 = arith.constant dense<0.000000e+00> : vector<16x128xf32>
    %35 = tpu.matmul %33, %34, %cst_34 {dimension_numbers = #tpu.dot_dimension_numbers<[1], [0], [0], [1], [0, 0, 1, 1], [], []>} : vector<16x128xf32>, vector<128x128xf32>, vector<16x128xf32> -> vector<16x128xf32>
    %c0_35 = arith.constant 0 : index
    %c0_36 = arith.constant 0 : index
    %36 = vector.load %arg14[%c0_35, %c0_36] : memref<1x128xf32, #tpu.memory_space<vmem>>, vector<1x128xf32>
    %37 = vector.broadcast %36 : vector<1x128xf32> to vector<16x128xf32>
    %38 = arith.addf %35, %37 : vector<16x128xf32>
    %c1 = arith.constant 1 : index
    %c0_37 = arith.constant 0 : index
    %c0_38 = arith.constant 0 : index
    %39 = vector.load %arg15[%c1, %c0_37, %c0_38] : memref<2x16x128xf32, #tpu.memory_space<vmem>>, vector<1x16x128xf32>
    %40 = vector.shape_cast %39 : vector<1x16x128xf32> to vector<16x128xf32>
    %41 = vector.shape_cast %38 : vector<16x128xf32> to vector<1x16x128xf32>
    tpu.vector_store %arg15[%c1, %c0_37, %c0_38], %41 {strides = array<i32>} : memref<2x16x128xf32, #tpu.memory_space<vmem>>, vector<1x16x128xf32>,
    return
  }
  func.func @transform_0(%arg0: i32) -> (i32, i32) {
    %c0_i32 = arith.constant 0 : i32
    %c0_i32_0 = arith.constant 0 : i32
    return %arg0, %c0_i32 : i32, i32
  }
  func.func @transform_1(%arg0: i32) -> (i32, i32) {
    %c0_i32 = arith.constant 0 : i32
    %c0_i32_0 = arith.constant 0 : i32
    return %arg0, %c0_i32 : i32, i32
  }
  func.func @transform_2(%arg0: i32) -> (i32, i32) {
    %c0_i32 = arith.constant 0 : i32
    %c0_i32_0 = arith.constant 0 : i32
    %c0_i32_1 = arith.constant 0 : i32
    return %c0_i32, %c0_i32_0 : i32, i32
  }
  func.func @transform_3(%arg0: i32) -> (i32, i32) {
    %c0_i32 = arith.constant 0 : i32
    %c0_i32_0 = arith.constant 0 : i32
    %c0_i32_1 = arith.constant 0 : i32
    return %c0_i32, %c0_i32_0 : i32, i32
  }
  func.func @transform_4(%arg0: i32) -> (i32, i32) {
    %c0_i32 = arith.constant 0 : i32
    %c0_i32_0 = arith.constant 0 : i32
    %c0_i32_1 = arith.constant 0 : i32
    return %c0_i32, %c0_i32_0 : i32, i32
  }
  func.func @transform_5(%arg0: i32) -> (i32, i32) {
    %c0_i32 = arith.constant 0 : i32
    %c0_i32_0 = arith.constant 0 : i32
    %c0_i32_1 = arith.constant 0 : i32
    return %c0_i32, %c0_i32_0 : i32, i32
  }
  func.func @transform_6(%arg0: i32) -> (i32, i32) {
    %c0_i32 = arith.constant 0 : i32
    %c0_i32_0 = arith.constant 0 : i32
    %c0_i32_1 = arith.constant 0 : i32
    return %c0_i32, %c0_i32_0 : i32, i32
  }
  func.func @transform_7(%arg0: i32) -> (i32, i32) {
    %c0_i32 = arith.constant 0 : i32
    %c0_i32_0 = arith.constant 0 : i32
    %c0_i32_1 = arith.constant 0 : i32
    return %c0_i32, %c0_i32_0 : i32, i32
  }
  func.func @transform_8(%arg0: i32) -> (i32, i32) {
    %c0_i32 = arith.constant 0 : i32
    %c0_i32_0 = arith.constant 0 : i32
    %c0_i32_1 = arith.constant 0 : i32
    return %c0_i32, %c0_i32_0 : i32, i32
  }
  func.func @transform_9(%arg0: i32) -> (i32, i32) {
    %c0_i32 = arith.constant 0 : i32
    %c0_i32_0 = arith.constant 0 : i32
    %c0_i32_1 = arith.constant 0 : i32
    return %c0_i32, %c0_i32_0 : i32, i32
  }
  func.func @transform_10(%arg0: i32) -> (i32, i32) {
    %c0_i32 = arith.constant 0 : i32
    %c0_i32_0 = arith.constant 0 : i32
    %c0_i32_1 = arith.constant 0 : i32
    return %c0_i32, %c0_i32_0 : i32, i32
  }
  func.func @transform_11(%arg0: i32) -> (i32, i32) {
    %c0_i32 = arith.constant 0 : i32
    %c0_i32_0 = arith.constant 0 : i32
    %c0_i32_1 = arith.constant 0 : i32
    return %c0_i32, %c0_i32_0 : i32, i32
  }
  func.func @transform_12(%arg0: i32) -> (i32, i32) {
    %c0_i32 = arith.constant 0 : i32
    %c0_i32_0 = arith.constant 0 : i32
    %c0_i32_1 = arith.constant 0 : i32
    return %c0_i32, %c0_i32_0 : i32, i32
  }
  func.func @transform_13(%arg0: i32) -> (i32, i32) {
    %c0_i32 = arith.constant 0 : i32
    %c0_i32_0 = arith.constant 0 : i32
    %c0_i32_1 = arith.constant 0 : i32
    return %c0_i32, %c0_i32_0 : i32, i32
  }
  func.func @transform_14(%arg0: i32) -> (i32, i32, i32) {
    %c0_i32 = arith.constant 0 : i32
    %c0_i32_0 = arith.constant 0 : i32
    %c0_i32_1 = arith.constant 0 : i32
    return %c0_i32, %arg0, %c0_i32_0 : i32, i32, i32
  }
}

</mosaic_0001>

<bundles_post_ra>
// kernel: tpu_custom_call.1
= control target key start
LH: loop header
LB: loop body
LE: loop exit
PB: predicated region body
PF: predicated region fallthrough
CT: control target
= control target key end

     0   :  { %19 = vsyncpa [#allocation3], 0  ;;  %s1464_s0 = inlined_call_operand.hbm [shape: f32[16,128], index: 0, kind: input, shape index: {}]   ;;  %s1465_s1 = inlined_call_operand.hbm [shape: f32[16,128], index: 1, kind: input, shape index: {}]   ;;  %s1466_s2 = inlined_call_operand.hbm [shape: f32[128,128], index: 2, kind: input, shape index: {}]   ;;  %s1467_s3 = inlined_call_operand.vmem [shape: f32[1,128], index: 3, kind: input, shape index: {}]   ;;  %s1468_s4 = inlined_call_operand.hbm [shape: f32[128,128], index: 4, kind: input, shape index: {}]   ;;  %s1469_s5 = inlined_call_operand.vmem [shape: f32[1,128], index: 5, kind: input, shape index: {}]   ;;  %s1470_s6 = inlined_call_operand.hbm [shape: f32[128,128], index: 6, kind: input, shape index: {}]   ;;  %s1471_s7 = inlined_call_operand.vmem [shape: f32[1,128], index: 7, kind: input, shape index: {}]   ;;  %s1472_s8 = inlined_call_operand.hbm [shape: f32[128,128], index: 8, kind: input, shape index: {}]   ;;  %s1473_s9 = inlined_call_operand.vmem [shape: f32[1,128], index: 9, kind: input, shape index: {}]   ;;  %s1474_s10 = inlined_call_operand.hbm [shape: f32[128,128], index: 10, kind: input, shape index: {}]   ;;  %s1475_s11 = inlined_call_operand.vmem [shape: f32[1,128], index: 11, kind: input, shape index: {}]   ;;  %s1476_s12 = inlined_call_operand.hbm [shape: f32[128,128], index: 12, kind: input, shape index: {}]   ;;  %s1477_s13 = inlined_call_operand.vmem [shape: f32[1,128], index: 13, kind: input, shape index: {}]   ;;  %s1478_s14 = inlined_call_operand.hbm [shape: f32[2,16,128], index: 14, kind: output, shape index: {}]  }
   0x1   :  { %20 = vsyncpa [#allocation6], 0 }
   0x2   :  { %21 = vsyncpa [#allocation9], 0 }
   0x3   :  { %22 = vsyncpa [#allocation12], 0 }
   0x4   :  { %23 = vsyncpa [#allocation15], 0 }
   0x5   :  { %24 = vsyncpa [#allocation4], 0  ;;  %s1306_s29 = smov [#allocation5]   ;;  %s1307_s15 = smov [#allocation8]  }
   0x6   :  { %s42_s30 = sshll.u32 %s1306_s29, 4  ;;  %s68_s16 = sshll.u32 %s1307_s15, 4  ;;  %s43_s30 = int_to_ptr.vmem [resolvable:$true] %s42_s30  ;;  %s69_s16 = int_to_ptr.vmem [resolvable:$true] %s68_s16 }
   0x7   :  { %s1122_s17 = scalar_lea.vmem %s43_s30, 256  ;;  %p1127_p1 = scmp.lt.s32.totalorder %s43_s30, %s43_s30 }
   0x8   :  { %p1123_p0 = scmp.ne.s32.totalorder %s43_s30, %s1122_s17  ;;  %p1128_p2 = scmp.lt.s32.totalorder %s1122_s17, %s1122_s17 }
   0xa   :  { %p1129_p3 = por %p1128_p2, %p1127_p1 }
   0xc   :  { %p1130_p4 = pnand %p1129_p3, %p1123_p0 }
   0xe   :  { %1133 = shalt.err (!%p1130_p4)
}
   0xf   :  { %s1308_s18 = smov 128   ;;  %s1309_s19 = smov 8  }
  0x10   :  { %48 = dma.hbm_to_vmem [thread:$0]  %s1465_s1, 256, %s43_s30, [#allocation6], %s1308_s18, %s1308_s18, %s1309_s19  }
  0x11   :  { %s1142_s22 = scalar_lea.vmem %s69_s16, 2048  ;;  %p1147_p6 = scmp.lt.s32.totalorder %s69_s16, %s69_s16 }
  0x12   :  { %p1143_p5 = scmp.ne.s32.totalorder %s69_s16, %s1142_s22  ;;  %p1148_p7 = scmp.lt.s32.totalorder %s1142_s22, %s1142_s22 }
  0x14   :  { %p1149_p8 = por %p1148_p7, %p1147_p6 }
  0x16   :  { %p1150_p9 = pnand %p1149_p8, %p1143_p5 }
  0x18   :  { %1153 = shalt.err (!%p1150_p9)
}
  0x19   :  { %74 = dma.hbm_to_vmem [thread:$0]  %s1468_s4, 2048, %s69_s16, [#allocation9], %s1308_s18, %s1308_s18, %s1309_s19  }
  0x1a   :  { %s1310_s25 = smov [#allocation11]   ;;  %s1311_s27 = smov [#allocation2]  }
  0x1b   :  { %s96_s26 = sshll.u32 %s1310_s25, 4  ;;  %s30_s28 = sshll.u32 %s1311_s27, 4  ;;  %s97_s26 = int_to_ptr.vmem [resolvable:$true] %s96_s26  ;;  %s31_s28 = int_to_ptr.vmem [resolvable:$true] %s30_s28 }
  0x1c   :  { %s1162_s1 = scalar_lea.vmem %s97_s26, 2048  ;;  %p1167_p11 = scmp.lt.s32.totalorder %s97_s26, %s97_s26 }
  0x1d   :  { %p1163_p10 = scmp.ne.s32.totalorder %s97_s26, %s1162_s1  ;;  %p1168_p12 = scmp.lt.s32.totalorder %s1162_s1, %s1162_s1 }
  0x1f   :  { %p1169_p13 = por %p1168_p12, %p1167_p11 }
  0x21   :  { %p1170_p0 = pnand %p1169_p13, %p1163_p10 }
  0x23   :  { %1173 = shalt.err (!%p1170_p0)
}
  0x24   :  { %102 = dma.hbm_to_vmem [thread:$0]  %s1472_s8, 2048, %s97_s26, [#allocation12], %s1308_s18, %s1308_s18, %s1309_s19  }
  0x25   :  { %s1182_s4 = scalar_lea.vmem %s31_s28, 256  ;;  %p1187_p2 = scmp.lt.s32.totalorder %s31_s28, %s31_s28 }
  0x26   :  { %p1183_p1 = scmp.ne.s32.totalorder %s31_s28, %s1182_s4  ;;  %p1188_p3 = scmp.lt.s32.totalorder %s1182_s4, %s1182_s4 }
  0x28   :  { %p1189_p4 = por %p1188_p3, %p1187_p2 }
  0x2a   :  { %p1190_p5 = pnand %p1189_p4, %p1183_p1 }
  0x2c   :  { %1193 = shalt.err (!%p1190_p5)
}
  0x2d   :  { %36 = dma.hbm_to_vmem [thread:$0]  %s1464_s0, 256, %s31_s28, [#allocation3], %s1308_s18, %s1308_s18, %s1309_s19  }
  0x2e   :  { %s1312_s17 = smov [#allocation7]   ;;  %s1313_s21 = smov [#allocation10]  }
  0x2f   :  { %s54_s20 = sshll.u32 %s1312_s17, 4  ;;  %s82_s22 = sshll.u32 %s1313_s21, 4  ;;  %s55_s20 = int_to_ptr.vmem [resolvable:$true] %s54_s20  ;;  %s83_s22 = int_to_ptr.vmem [resolvable:$true] %s82_s22 }
  0x30   :  { %s1202_s8 = scalar_lea.vmem %s55_s20, 2048  ;;  %p1207_p7 = scmp.lt.s32.totalorder %s55_s20, %s55_s20 }
  0x31   :  { %p1203_p6 = scmp.ne.s32.totalorder %s55_s20, %s1202_s8  ;;  %p1208_p8 = scmp.lt.s32.totalorder %s1202_s8, %s1202_s8 }
  0x33   :  { %p1209_p9 = por %p1208_p8, %p1207_p7 }
  0x35   :  { %p1210_p10 = pnand %p1209_p9, %p1203_p6 }
  0x37   :  { %1213 = shalt.err (!%p1210_p10)
}
  0x38   :  { %60 = dma.hbm_to_vmem [thread:$0]  %s1466_s2, 2048, %s55_s20, [#allocation6], %s1308_s18, %s1308_s18, %s1309_s19  }
  0x39   :  { %s1222_s0 = scalar_lea.vmem %s83_s22, 2048  ;;  %p1227_p12 = scmp.lt.s32.totalorder %s83_s22, %s83_s22 }
  0x3a   :  { %p1223_p11 = scmp.ne.s32.totalorder %s83_s22, %s1222_s0  ;;  %p1228_p13 = scmp.lt.s32.totalorder %s1222_s0, %s1222_s0 }
  0x3c   :  { %p1229_p0 = por %p1228_p13, %p1227_p12 }
  0x3e   :  { %p1230_p1 = pnand %p1229_p0, %p1223_p11 }
  0x40   :  { %1233 = shalt.err (!%p1230_p1)
}
  0x41   :  { %88 = dma.hbm_to_vmem [thread:$0]  %s1470_s6, 2048, %s83_s22, [#allocation9], %s1308_s18, %s1308_s18, %s1309_s19  }
  0x42   :  { %s1314_s27 = smov [#allocation13]   ;;  %s1315_s1 = smov [#allocation14]  }
  0x43   :  { %s110_s28 = sshll.u32 %s1314_s27, 4  ;;  %s124_s29 = sshll.u32 %s1315_s1, 4  ;;  %s111_s28 = int_to_ptr.vmem [resolvable:$true] %s110_s28  ;;  %s125_s29 = int_to_ptr.vmem [resolvable:$true] %s124_s29 }
  0x44   :  { %s1242_s2 = scalar_lea.vmem %s111_s28, 2048  ;;  %p1247_p3 = scmp.lt.s32.totalorder %s111_s28, %s111_s28 }
  0x45   :  { %p1243_p2 = scmp.ne.s32.totalorder %s111_s28, %s1242_s2  ;;  %p1248_p4 = scmp.lt.s32.totalorder %s1242_s2, %s1242_s2 }
  0x47   :  { %p1249_p5 = por %p1248_p4, %p1247_p3 }
  0x49   :  { %p1250_p6 = pnand %p1249_p5, %p1243_p2 }
  0x4b   :  { %1253 = shalt.err (!%p1250_p6)
}
  0x4c   :  { %116 = dma.hbm_to_vmem [thread:$0]  %s1474_s10, 2048, %s111_s28, [#allocation12], %s1308_s18, %s1308_s18, %s1309_s19  }
  0x4d   :  { %s1262_s6 = scalar_lea.vmem %s125_s29, 2048  ;;  %p1267_p8 = scmp.lt.s32.totalorder %s125_s29, %s125_s29 }
  0x4e   :  { %p1263_p7 = scmp.ne.s32.totalorder %s125_s29, %s1262_s6  ;;  %p1268_p9 = scmp.lt.s32.totalorder %s1262_s6, %s1262_s6 }
  0x50   :  { %p1269_p10 = por %p1268_p9, %p1267_p8 }
  0x52   :  { %p1270_p11 = pnand %p1269_p10, %p1263_p7 }
  0x54   :  { %1273 = shalt.err (!%p1270_p11)
}
  0x55   :  { %130 = dma.hbm_to_vmem [thread:$0]  %s1476_s12, 2048, %s125_s29, [#allocation15], %s1308_s18, %s1308_s18, %s1309_s19  }
  0x56   :  { %1294 = dma.done.wait [#allocation3], 256  }
  0x57   :  { %1295 = vsyncadd [#allocation3], 4294967040 }
  0x58   :  { %1296 = dma.done.wait [#allocation6], 2304  }
  0x59   :  { %1297 = vsyncadd [#allocation6], 4294964992 }
  0x5a   :  { %1298 = dma.done.wait [#allocation9], 4096  }
  0x5b   :  { %1299 = vsyncadd [#allocation9], 4294963200 }
  0x5c   :  { %1300 = dma.done.wait [#allocation12], 4096  }
  0x5d   :  { %1301 = vsyncadd [#allocation12], 4294963200 }
  0x5e   :  { %1302 = dma.done.wait [#allocation15], 2048  }
  0x5f   :  { %1303 = vsyncadd [#allocation15], 4294965248  ;;  %v174_v0 = vld [vmem:[#allocation7 + $0x78] sm:$0xff]  ;;  %v173_v1 = vld [vmem:[#allocation7 + $0x70] sm:$0xff]  ;;  %s1316_s24 = smov [#allocation16]  }
  0x60   :  { %893 = vmatprep.subr.mxu0 %v174_v0  ;;  %v172_v2 = vld [vmem:[#allocation7 + $0x68] sm:$0xff]  ;;  %v171_v3 = vld [vmem:[#allocation7 + $0x60] sm:$0xff]  ;;  %v170_v5 = vld [vmem:[#allocation7 + $0x58] sm:$0xff]  ;;  %s763_s0 = sshll.u32 %s1316_s24, 4  ;;  %s764_s0 = int_to_ptr.vmem [resolvable:$true] %s763_s0 }
  0x61   :  { %894 = vmatpush3.msra.mxu0 %v174_v0  ;;  %v157_v4 = vld [vmem:[#allocation2] sm:$0xff]  ;;  %v272_v6 = vld [vmem:[#allocation8 + $0x78] sm:$0xff]  ;;  %v271_v7 = vld [vmem:[#allocation8 + $0x70] sm:$0xff]  ;;  %p1279_p13 = scmp.lt.s32.totalorder %s764_s0, %s764_s0 }
  0x62   :  { %895 = vmatprep.subr.mxu0 %v173_v1  ;;  %925 = vmatprep.mubr.f32.mxu0 %v157_v4  ;;  %v169_v8 = vld [vmem:[#allocation7 + $0x50] sm:$0xff]  ;;  %v270_v9 = vld [vmem:[#allocation8 + $0x68] sm:$0xff]  ;;  %v269_v11 = vld [vmem:[#allocation8 + $0x60] sm:$0xff] }
  0x63   :  { %896 = vmatpush3.msra.mxu0 %v173_v1  ;;  %928 = vmatprep.subr.mxu1 %v272_v6  ;;  %v168_v10 = vld [vmem:[#allocation7 + $0x48] sm:$0xff]  ;;  %v167_v12 = vld [vmem:[#allocation7 + $0x40] sm:$0xff]  ;;  %v268_v13 = vld [vmem:[#allocation8 + $0x58] sm:$0xff] }
  0x64   :  { %897 = vmatprep.subr.mxu0 %v172_v2  ;;  %929 = vmatpush3.msra.mxu1 %v272_v6  ;;  %v166_v14 = vld [vmem:[#allocation7 + $0x38] sm:$0xff]  ;;  %v267_v15 = vld [vmem:[#allocation8 + $0x50] sm:$0xff]  ;;  %v266_v17 = vld [vmem:[#allocation8 + $0x48] sm:$0xff] }
  0x65   :  { %898 = vmatpush3.msra.mxu0 %v172_v2  ;;  %930 = vmatprep.subr.mxu1 %v271_v7  ;;  %v165_v16 = vld [vmem:[#allocation7 + $0x30] sm:$0xff]  ;;  %v164_v18 = vld [vmem:[#allocation7 + $0x28] sm:$0xff]  ;;  %v265_v19 = vld [vmem:[#allocation8 + $0x40] sm:$0xff] }
  0x66   :  { %899 = vmatprep.subr.mxu0 %v171_v3  ;;  %931 = vmatpush3.msra.mxu1 %v271_v7  ;;  %v163_v20 = vld [vmem:[#allocation7 + $0x20] sm:$0xff]  ;;  %v264_v21 = vld [vmem:[#allocation8 + $0x38] sm:$0xff]  ;;  %v263_v23 = vld [vmem:[#allocation8 + $0x30] sm:$0xff] }
  0x67   :  { %900 = vmatpush3.msra.mxu0 %v171_v3  ;;  %932 = vmatprep.subr.mxu1 %v270_v9  ;;  %v162_v22 = vld [vmem:[#allocation7 + $0x18] sm:$0xff]  ;;  %v161_v24 = vld [vmem:[#allocation7 + $0x10] sm:$0xff]  ;;  %v262_v25 = vld [vmem:[#allocation8 + $0x28] sm:$0xff] }
  0x68   :  { %901 = vmatprep.subr.mxu0 %v170_v5  ;;  %933 = vmatpush3.msra.mxu1 %v270_v9  ;;  %v160_v26 = vld [vmem:[#allocation7 + $0x8] sm:$0xff]  ;;  %v261_v27 = vld [vmem:[#allocation8 + $0x20] sm:$0xff]  ;;  %v260_v29 = vld [vmem:[#allocation8 + $0x18] sm:$0xff] }
  0x69   :  { %902 = vmatpush3.msra.mxu0 %v170_v5  ;;  %934 = vmatprep.subr.mxu1 %v269_v11  ;;  %v159_v28 = vld [vmem:[#allocation7] sm:$0xff]  ;;  %v158_v30 = vld [vmem:[#allocation2 + $0x8] sm:$0xff]  ;;  %v259_v31 = vld [vmem:[#allocation8 + $0x10] sm:$0xff] }
  0x6a   :  { %903 = vmatprep.subr.mxu0 %v169_v8  ;;  %935 = vmatpush3.msra.mxu1 %v269_v11  ;;  %v258_v32 = vld [vmem:[#allocation8 + $0x8] sm:$0xff]  ;;  %v257_v33 = vld [vmem:[#allocation8] sm:$0xff]  ;;  %v474_v34 = vld [vmem:[#allocation11 + $0x78] sm:$0xff] }
  0x6b   :  { %904 = vmatpush3.msra.mxu0 %v169_v8  ;;  %936 = vmatprep.subr.mxu1 %v268_v13  ;;  %v372_v35 = vld [vmem:[#allocation10 + $0x78] sm:$0xff]  ;;  %v371_v36 = vld [vmem:[#allocation10 + $0x70] sm:$0xff]  ;;  %v370_v37 = vld [vmem:[#allocation10 + $0x68] sm:$0xff] }
  0x6c   :  { %905 = vmatprep.subr.mxu0 %v168_v10  ;;  %937 = vmatpush3.msra.mxu1 %v268_v13  ;;  %v369_v38 = vld [vmem:[#allocation10 + $0x60] sm:$0xff]  ;;  %v368_v39 = vld [vmem:[#allocation10 + $0x58] sm:$0xff]  ;;  %v367_v40 = vld [vmem:[#allocation10 + $0x50] sm:$0xff] }
  0x6d   :  { %906 = vmatpush3.msra.mxu0 %v168_v10  ;;  %938 = vmatprep.subr.mxu1 %v267_v15  ;;  %v366_v41 = vld [vmem:[#allocation10 + $0x48] sm:$0xff]  ;;  %v365_v42 = vld [vmem:[#allocation10 + $0x40] sm:$0xff]  ;;  %v364_v43 = vld [vmem:[#allocation10 + $0x38] sm:$0xff] }
  0x6e   :  { %907 = vmatprep.subr.mxu0 %v167_v12  ;;  %939 = vmatpush3.msra.mxu1 %v267_v15  ;;  %v363_v44 = vld [vmem:[#allocation10 + $0x30] sm:$0xff]  ;;  %v362_v45 = vld [vmem:[#allocation10 + $0x28] sm:$0xff]  ;;  %v361_v46 = vld [vmem:[#allocation10 + $0x20] sm:$0xff] }
  0x6f   :  { %908 = vmatpush3.msra.mxu0 %v167_v12  ;;  %940 = vmatprep.subr.mxu1 %v266_v17  ;;  %v360_v47 = vld [vmem:[#allocation10 + $0x18] sm:$0xff]  ;;  %v779_v49 = vld [vmem:[%s1467_s3] ss:$0 sm:$0xff]  ;;  %v457_v53 = vld [vmem:[#allocation5] sm:$0xff] }
  0x70   :  { %909 = vmatprep.subr.mxu0 %v166_v14  ;;  %941 = vmatpush3.msra.mxu1 %v266_v17  ;;  %v473_v54 = vld [vmem:[#allocation11 + $0x70] sm:$0xff]  ;;  %v472_v55 = vld [vmem:[#allocation11 + $0x68] sm:$0xff]  ;;  %v471_v56 = vld [vmem:[#allocation11 + $0x60] sm:$0xff] }
  0x71   :  { %910 = vmatpush3.msra.mxu0 %v166_v14  ;;  %942 = vmatprep.subr.mxu1 %v265_v19  ;;  %v470_v57 = vld [vmem:[#allocation11 + $0x58] sm:$0xff]  ;;  %v469_v58 = vld [vmem:[#allocation11 + $0x50] sm:$0xff]  ;;  %v468_v59 = vld [vmem:[#allocation11 + $0x48] sm:$0xff] }
  0x72   :  { %911 = vmatprep.subr.mxu0 %v165_v16  ;;  %943 = vmatpush3.msra.mxu1 %v265_v19  ;;  %v467_v60 = vld [vmem:[#allocation11 + $0x40] sm:$0xff]  ;;  %v466_v61 = vld [vmem:[#allocation11 + $0x38] sm:$0xff]  ;;  %v465_v62 = vld [vmem:[#allocation11 + $0x30] sm:$0xff] }
  0x73   :  { %912 = vmatpush3.msra.mxu0 %v165_v16  ;;  %944 = vmatprep.subr.mxu1 %v264_v21  ;;  %v464_v63 = vld [vmem:[#allocation11 + $0x28] sm:$0xff]  ;;  %v463_v0 = vld [vmem:[#allocation11 + $0x20] sm:$0xff]  ;;  %v462_v1 = vld [vmem:[#allocation11 + $0x18] sm:$0xff] }
  0x74   :  { %913 = vmatprep.subr.mxu0 %v164_v18  ;;  %945 = vmatpush3.msra.mxu1 %v264_v21  ;;  %v461_v2 = vld [vmem:[#allocation11 + $0x10] sm:$0xff]  ;;  %v460_v3 = vld [vmem:[#allocation11 + $0x8] sm:$0xff]  ;;  %v459_v4 = vld [vmem:[#allocation11] sm:$0xff] }
  0x75   :  { %914 = vmatpush3.msra.mxu0 %v164_v18  ;;  %946 = vmatprep.subr.mxu1 %v263_v23  ;;  %v458_v5 = vld [vmem:[#allocation5 + $0x8] sm:$0xff]  ;;  %v359_v6 = vld [vmem:[#allocation10 + $0x10] sm:$0xff]  ;;  %v358_v7 = vld [vmem:[#allocation10 + $0x8] sm:$0xff] }
  0x76   :  { %915 = vmatprep.subr.mxu0 %v163_v20  ;;  %947 = vmatpush3.msra.mxu1 %v263_v23  ;;  %v357_v8 = vld [vmem:[#allocation10] sm:$0xff]  ;;  %v572_v9 = vld [vmem:[#allocation13 + $0x78] sm:$0xff]  ;;  %v571_v17 = vld [vmem:[#allocation13 + $0x70] sm:$0xff] }
  0x77   :  { %916 = vmatpush3.msra.mxu0 %v163_v20  ;;  %948 = vmatprep.subr.mxu1 %v262_v25  ;;  %v780_v10 = vld [vmem:[%s1469_s5] ss:$0 sm:$0xff]  ;;  %v570_v18 = vld [vmem:[#allocation13 + $0x68] sm:$0xff]  ;;  %v568_v20 = vld [vmem:[#allocation13 + $0x58] sm:$0xff] }
  0x78   :  { %917 = vmatprep.subr.mxu0 %v162_v22  ;;  %949 = vmatpush3.msra.mxu1 %v262_v25  ;;  %v569_v19 = vld [vmem:[#allocation13 + $0x60] sm:$0xff]  ;;  %v567_v21 = vld [vmem:[#allocation13 + $0x50] sm:$0xff] }
  0x79   :  { %918 = vmatpush3.msra.mxu0 %v162_v22  ;;  %950 = vmatprep.subr.mxu1 %v261_v27  ;;  %v566_v22 = vld [vmem:[#allocation13 + $0x48] sm:$0xff]  ;;  %v565_v23 = vld [vmem:[#allocation13 + $0x40] sm:$0xff]  ;;  %v563_v25 = vld [vmem:[#allocation13 + $0x30] sm:$0xff] }
  0x7a   :  { %919 = vmatprep.subr.mxu0 %v161_v24  ;;  %951 = vmatpush3.msra.mxu1 %v261_v27  ;;  %v561_v27 = vld [vmem:[#allocation13 + $0x20] sm:$0xff] }
  0x7b   :  { %920 = vmatpush3.msra.mxu0 %v161_v24  ;;  %952 = vmatprep.subr.mxu1 %v260_v29  ;;  %v564_v24 = vld [vmem:[#allocation13 + $0x38] sm:$0xff] }
  0x7c   :  { %921 = vmatprep.subr.mxu0 %v160_v26  ;;  %953 = vmatpush3.msra.mxu1 %v260_v29  ;;  %v559_v29 = vld [vmem:[#allocation13 + $0x10] sm:$0xff] }
  0x7d   :  { %922 = vmatpush3.msra.mxu0 %v160_v26  ;;  %954 = vmatprep.subr.mxu1 %v259_v31  ;;  %v562_v26 = vld [vmem:[#allocation13 + $0x28] sm:$0xff] }
  0x7e   :  { %923 = vmatprep.subr.mxu0 %v159_v28  ;;  %955 = vmatpush3.msra.mxu1 %v259_v31  ;;  %v782_v31 = vld [vmem:[%s1473_s9] ss:$0 sm:$0xff] }
  0x7f   :  { %924 = vmatpush3.msra.mxu0 %v159_v28  ;;  %956 = vmatprep.subr.mxu1 %v258_v32  ;;  %v560_v28 = vld [vmem:[#allocation13 + $0x18] sm:$0xff] }
  0x80   :  { %926 = vmatmul.mubr.f32.vlgmr.msra.gmra.mxu0 %v158_v30  ;;  %957 = vmatpush3.msra.mxu1 %v258_v32  ;;  %v558_v32 = vld [vmem:[#allocation13 + $0x8] sm:$0xff] }
  0x81   :  { %958 = vmatprep.subr.mxu1 %v257_v33  ;;  %963 = vmatprep.subr.mxu0 %v372_v35 }
  0x82   :  { %959 = vmatpush3.msra.mxu1 %v257_v33  ;;  %964 = vmatpush3.msra.mxu0 %v372_v35  ;;  %v557_v35 = vld [vmem:[#allocation13] sm:$0xff] }
  0x83   :  { %998 = vmatprep.subr.mxu1 %v474_v34  ;;  %965 = vmatprep.subr.mxu0 %v371_v36 }
  0x84   :  { %966 = vmatpush3.msra.mxu0 %v371_v36 }
  0x85   :  { %967 = vmatprep.subr.mxu0 %v370_v37 }
  0x86   :  { %968 = vmatpush3.msra.mxu0 %v370_v37  ;;  %v672_v37 = vld [vmem:[#allocation14 + $0x78] sm:$0xff] }
  0x87   :  { %969 = vmatprep.subr.mxu0 %v369_v38 }
  0x88   :  { %970 = vmatpush3.msra.mxu0 %v369_v38  ;;  %v671_v38 = vld [vmem:[#allocation14 + $0x70] sm:$0xff] }
  0x89   :  { %971 = vmatprep.subr.mxu0 %v368_v39 }
  0x8a   :  { %972 = vmatpush3.msra.mxu0 %v368_v39  ;;  %v670_v39 = vld [vmem:[#allocation14 + $0x68] sm:$0xff] }
  0x8b   :  { %973 = vmatprep.subr.mxu0 %v367_v40 }
  0x8c   :  { %974 = vmatpush3.msra.mxu0 %v367_v40  ;;  %v669_v40 = vld [vmem:[#allocation14 + $0x60] sm:$0xff] }
  0x8d   :  { %975 = vmatprep.subr.mxu0 %v366_v41 }
  0x8e   :  { %976 = vmatpush3.msra.mxu0 %v366_v41  ;;  %v668_v41 = vld [vmem:[#allocation14 + $0x58] sm:$0xff] }
  0x8f   :  { %977 = vmatprep.subr.mxu0 %v365_v42 }
  0x90   :  { %978 = vmatpush3.msra.mxu0 %v365_v42  ;;  %v667_v42 = vld [vmem:[#allocation14 + $0x50] sm:$0xff] }
  0x91   :  { %979 = vmatprep.subr.mxu0 %v364_v43 }
  0x92   :  { %980 = vmatpush3.msra.mxu0 %v364_v43  ;;  %v666_v43 = vld [vmem:[#allocation14 + $0x48] sm:$0xff] }
  0x93   :  { %981 = vmatprep.subr.mxu0 %v363_v44 }
  0x94   :  { %982 = vmatpush3.msra.mxu0 %v363_v44  ;;  %v665_v44 = vld [vmem:[#allocation14 + $0x40] sm:$0xff] }
  0x95   :  { %983 = vmatprep.subr.mxu0 %v362_v45 }
  0x96   :  { %984 = vmatpush3.msra.mxu0 %v362_v45  ;;  %v664_v45 = vld [vmem:[#allocation14 + $0x38] sm:$0xff] }
  0x97   :  { %985 = vmatprep.subr.mxu0 %v361_v46 }
  0x98   :  { %986 = vmatpush3.msra.mxu0 %v361_v46  ;;  %v663_v46 = vld [vmem:[#allocation14 + $0x30] sm:$0xff] }
  0x99   :  { %987 = vmatprep.subr.mxu0 %v360_v47 }
  0x9a   :  { %988 = vmatpush3.msra.mxu0 %v360_v47  ;;  %v662_v47 = vld [vmem:[#allocation14 + $0x28] sm:$0xff] }
  0x9b   :  { %989 = vmatprep.subr.mxu0 %v359_v6 }
  0x9c   :  { %990 = vmatpush3.msra.mxu0 %v359_v6 }
  0x9d   :  { %991 = vmatprep.subr.mxu0 %v358_v7 }
  0x9e   :  { %992 = vmatpush3.msra.mxu0 %v358_v7 }
  0x9f   :  { %993 = vmatprep.subr.mxu0 %v357_v8 }
  0xa0   :  { %994 = vmatpush3.msra.mxu0 %v357_v8 }
  0xa1   :  { %1033 = vmatprep.subr.mxu0 %v572_v9 }
 0x140   :  { %v927_v48 = vpop.f32.mrf.mxu0 }
 0x141   :  { %v254_v52 = vadd.f32 %v927_v48, %v779_v49  ;;  %v661_v48 = vld [vmem:[#allocation14 + $0x20] sm:$0xff] }
 0x142   :  { %v248_v50 = vpop.f32.mrf.mxu0 }
 0x143   :  { %v249_v51 = vadd.f32 %v779_v49, %v248_v50  ;;  %v660_v49 = vld [vmem:[#allocation14 + $0x18] sm:$0xff]  ;;  %v659_v50 = vld [vmem:[#allocation14 + $0x10] sm:$0xff] }
 0x145   :  { %960 = vmatprep.mubr.f32.mxu1 %v249_v51  ;;  %v658_v51 = vld [vmem:[#allocation14 + $0x8] sm:$0xff] }
 0x146   :  { %961 = vmatmul.mubr.f32.vlgmr.msra.gmra.mxu1 %v254_v52  ;;  %v657_v52 = vld [vmem:[#allocation14] sm:$0xff] }
 0x147   :  { %999 = vmatpush3.msra.mxu1 %v474_v34  ;;  %1030 = vmatprep.mubr.f32.mxu1 %v457_v53  ;;  %v781_v53 = vld [vmem:[%s1471_s7] ss:$0 sm:$0xff] }
 0x148   :  { %1000 = vmatprep.subr.mxu1 %v473_v54 }
 0x149   :  { %1001 = vmatpush3.msra.mxu1 %v473_v54 }
 0x14a   :  { %1002 = vmatprep.subr.mxu1 %v472_v55 }
 0x14b   :  { %1003 = vmatpush3.msra.mxu1 %v472_v55 }
 0x14c   :  { %1004 = vmatprep.subr.mxu1 %v471_v56 }
 0x14d   :  { %1005 = vmatpush3.msra.mxu1 %v471_v56 }
 0x14e   :  { %1006 = vmatprep.subr.mxu1 %v470_v57 }
 0x14f   :  { %1007 = vmatpush3.msra.mxu1 %v470_v57 }
 0x150   :  { %1008 = vmatprep.subr.mxu1 %v469_v58 }
 0x151   :  { %1009 = vmatpush3.msra.mxu1 %v469_v58  ;;  %v783_v58 = vld [vmem:[%s1475_s11] ss:$0 sm:$0xff]  ;;  %s1274_s11 = scalar_lea.vmem %s764_s0, 512 }
 0x152   :  { %1010 = vmatprep.subr.mxu1 %v468_v59  ;;  %p1275_p12 = scmp.ne.s32.totalorder %s764_s0, %s1274_s11  ;;  %p1280_p0 = scmp.lt.s32.totalorder %s1274_s11, %s1274_s11 }
 0x153   :  { %1011 = vmatpush3.msra.mxu1 %v468_v59 }
 0x154   :  { %1012 = vmatprep.subr.mxu1 %v467_v60  ;;  %p1281_p1 = por %p1280_p0, %p1279_p13 }
 0x155   :  { %1013 = vmatpush3.msra.mxu1 %v467_v60 }
 0x156   :  { %1014 = vmatprep.subr.mxu1 %v466_v61  ;;  %p1282_p2 = pnand %p1281_p1, %p1275_p12 }
 0x157   :  { %1015 = vmatpush3.msra.mxu1 %v466_v61 }
 0x158   :  { %1016 = vmatprep.subr.mxu1 %v465_v62 }
 0x159   :  { %1017 = vmatpush3.msra.mxu1 %v465_v62 }
 0x15a   :  { %1018 = vmatprep.subr.mxu1 %v464_v63 }
 0x15b   :  { %1019 = vmatpush3.msra.mxu1 %v464_v63 }
 0x15c   :  { %1020 = vmatprep.subr.mxu1 %v463_v0 }
 0x15d   :  { %1021 = vmatpush3.msra.mxu1 %v463_v0 }
 0x15e   :  { %1022 = vmatprep.subr.mxu1 %v462_v1 }
 0x15f   :  { %1023 = vmatpush3.msra.mxu1 %v462_v1  ;;  %v784_v1 = vld [vmem:[%s1477_s13] ss:$0 sm:$0xff] }
 0x160   :  { %1024 = vmatprep.subr.mxu1 %v461_v2 }
 0x161   :  { %1025 = vmatpush3.msra.mxu1 %v461_v2 }
 0x162   :  { %1026 = vmatprep.subr.mxu1 %v460_v3 }
 0x163   :  { %1027 = vmatpush3.msra.mxu1 %v460_v3 }
 0x164   :  { %1028 = vmatprep.subr.mxu1 %v459_v4 }
 0x165   :  { %1029 = vmatpush3.msra.mxu1 %v459_v4 }
 0x166   :  { %1031 = vmatmul.mubr.f32.vlgmr.msra.gmra.mxu1 %v458_v5  ;;  %1068 = vmatprep.subr.mxu1 %v672_v37 }
 0x167   :  { %1069 = vmatpush3.msra.mxu1 %v672_v37 }
 0x168   :  { %1070 = vmatprep.subr.mxu1 %v671_v38 }
 0x169   :  { %1071 = vmatpush3.msra.mxu1 %v671_v38 }
 0x16a   :  { %1072 = vmatprep.subr.mxu1 %v670_v39 }
 0x16b   :  { %1073 = vmatpush3.msra.mxu1 %v670_v39 }
 0x16c   :  { %1074 = vmatprep.subr.mxu1 %v669_v40 }
 0x16d   :  { %1075 = vmatpush3.msra.mxu1 %v669_v40 }
 0x16e   :  { %1076 = vmatprep.subr.mxu1 %v668_v41 }
 0x16f   :  { %1077 = vmatpush3.msra.mxu1 %v668_v41 }
 0x170   :  { %1078 = vmatprep.subr.mxu1 %v667_v42 }
 0x171   :  { %1079 = vmatpush3.msra.mxu1 %v667_v42 }
 0x172   :  { %1080 = vmatprep.subr.mxu1 %v666_v43 }
 0x173   :  { %1081 = vmatpush3.msra.mxu1 %v666_v43 }
 0x174   :  { %1082 = vmatprep.subr.mxu1 %v665_v44 }
 0x175   :  { %1083 = vmatpush3.msra.mxu1 %v665_v44 }
 0x176   :  { %1084 = vmatprep.subr.mxu1 %v664_v45 }
 0x177   :  { %1085 = vmatpush3.msra.mxu1 %v664_v45 }
 0x178   :  { %1086 = vmatprep.subr.mxu1 %v663_v46 }
 0x179   :  { %1087 = vmatpush3.msra.mxu1 %v663_v46 }
 0x17a   :  { %1088 = vmatprep.subr.mxu1 %v662_v47 }
 0x17b   :  { %1089 = vmatpush3.msra.mxu1 %v662_v47 }
 0x17c   :  { %1090 = vmatprep.subr.mxu1 %v661_v48 }
 0x17d   :  { %1091 = vmatpush3.msra.mxu1 %v661_v48 }
 0x17e   :  { %1092 = vmatprep.subr.mxu1 %v660_v49 }
 0x17f   :  { %1093 = vmatpush3.msra.mxu1 %v660_v49 }
 0x180   :  { %1094 = vmatprep.subr.mxu1 %v659_v50 }
 0x181   :  { %1095 = vmatpush3.msra.mxu1 %v659_v50 }
 0x182   :  { %1096 = vmatprep.subr.mxu1 %v658_v51 }
 0x183   :  { %1097 = vmatpush3.msra.mxu1 %v658_v51 }
 0x184   :  { %1098 = vmatprep.subr.mxu1 %v657_v52 }
 0x185   :  { %1099 = vmatpush3.msra.mxu1 %v657_v52 }
 0x206   :  { %v962_v11 = vpop.f32.mrf.mxu1 }
 0x207   :  { %v352_v12 = vadd.f32 %v962_v11, %v780_v10 }
 0x208   :  { %v346_v13 = vpop.f32.mrf.mxu1 }
 0x209   :  { %v347_v14 = vadd.f32 %v780_v10, %v346_v13  ;;  %v356_v16 = vmax.f32 %v352_v12, 0.0 }
 0x20b   :  { %v355_v15 = vmax.f32 %v347_v14, 0.0 }
 0x20d   :  { %995 = vmatprep.mubr.f32.mxu0 %v355_v15 }
 0x20e   :  { %996 = vmatmul.mubr.f32.vlgmr.msra.gmra.mxu0 %v356_v16 }
 0x20f   :  { %1034 = vmatpush3.msra.mxu0 %v572_v9 }
 0x210   :  { %1035 = vmatprep.subr.mxu0 %v571_v17 }
 0x211   :  { %1036 = vmatpush3.msra.mxu0 %v571_v17 }
 0x212   :  { %1037 = vmatprep.subr.mxu0 %v570_v18 }
 0x213   :  { %1038 = vmatpush3.msra.mxu0 %v570_v18 }
 0x214   :  { %1039 = vmatprep.subr.mxu0 %v569_v19 }
 0x215   :  { %1040 = vmatpush3.msra.mxu0 %v569_v19 }
 0x216   :  { %1041 = vmatprep.subr.mxu0 %v568_v20 }
 0x217   :  { %1042 = vmatpush3.msra.mxu0 %v568_v20 }
 0x218   :  { %1043 = vmatprep.subr.mxu0 %v567_v21 }
 0x219   :  { %1044 = vmatpush3.msra.mxu0 %v567_v21 }
 0x21a   :  { %1045 = vmatprep.subr.mxu0 %v566_v22 }
 0x21b   :  { %1046 = vmatpush3.msra.mxu0 %v566_v22 }
 0x21c   :  { %1047 = vmatprep.subr.mxu0 %v565_v23 }
 0x21d   :  { %1048 = vmatpush3.msra.mxu0 %v565_v23 }
 0x21e   :  { %1049 = vmatprep.subr.mxu0 %v564_v24 }
 0x21f   :  { %1050 = vmatpush3.msra.mxu0 %v564_v24 }
 0x220   :  { %1051 = vmatprep.subr.mxu0 %v563_v25 }
 0x221   :  { %1052 = vmatpush3.msra.mxu0 %v563_v25 }
 0x222   :  { %1053 = vmatprep.subr.mxu0 %v562_v26 }
 0x223   :  { %1054 = vmatpush3.msra.mxu0 %v562_v26 }
 0x224   :  { %1055 = vmatprep.subr.mxu0 %v561_v27 }
 0x225   :  { %1056 = vmatpush3.msra.mxu0 %v561_v27 }
 0x226   :  { %v1032_v30 = vpop.f32.mrf.mxu1  ;;  %1057 = vmatprep.subr.mxu0 %v560_v28 }
 0x227   :  { %1058 = vmatpush3.msra.mxu0 %v560_v28  ;;  %v554_v36 = vadd.f32 %v1032_v30, %v782_v31 }
 0x228   :  { %v548_v33 = vpop.f32.mrf.mxu1  ;;  %1059 = vmatprep.subr.mxu0 %v559_v29 }
 0x229   :  { %v549_v34 = vadd.f32 %v782_v31, %v548_v33  ;;  %1060 = vmatpush3.msra.mxu0 %v559_v29 }
 0x22a   :  { %1061 = vmatprep.subr.mxu0 %v558_v32 }
 0x22b   :  { %1062 = vmatpush3.msra.mxu0 %v558_v32  ;;  %1065 = vmatprep.mubr.f32.mxu0 %v549_v34 }
 0x22c   :  { %1063 = vmatprep.subr.mxu0 %v557_v35 }
 0x22d   :  { %1064 = vmatpush3.msra.mxu0 %v557_v35 }
 0x22e   :  { %1066 = vmatmul.mubr.f32.vlgmr.msra.gmra.mxu0 %v554_v36 }
 0x2ce   :  { %v997_v54 = vpop.f32.mrf.mxu0 }
 0x2cf   :  { %v452_v55 = vadd.f32 %v997_v54, %v781_v53 }
 0x2d0   :  { %v446_v56 = vpop.f32.mrf.mxu0 }
 0x2d1   :  { %456 = vst [vmem:[#allocation16 + $0x8] sm:$0xff] %v452_v55  ;;  %v447_v57 = vadd.f32 %v781_v53, %v446_v56 }
 0x2d3   :  { %455 = vst [vmem:[#allocation16] sm:$0xff] %v447_v57 }
 0x2ee   :  { %v1067_v59 = vpop.f32.mrf.mxu0 }
 0x2ef   :  { %v652_v60 = vadd.f32 %v1067_v59, %v783_v58 }
 0x2f0   :  { %v646_v61 = vpop.f32.mrf.mxu0 }
 0x2f1   :  { %v647_v62 = vadd.f32 %v783_v58, %v646_v61  ;;  %v656_v0 = vmax.f32 %v652_v60, 0.0 }
 0x2f3   :  { %v655_v63 = vmax.f32 %v647_v62, 0.0 }
 0x2f5   :  { %1100 = vmatprep.mubr.f32.mxu1 %v655_v63 }
 0x2f6   :  { %1101 = vmatmul.mubr.f32.vlgmr.msra.gmra.mxu1 %v656_v0 }
 0x3b6   :  { %v1102_v2 = vpop.f32.mrf.mxu1 }
 0x3b7   :  { %v752_v3 = vadd.f32 %v1102_v2, %v784_v1 }
 0x3b8   :  { %v746_v4 = vpop.f32.mrf.mxu1 }
 0x3b9   :  { %757 = vst [vmem:[#allocation16 + $0x18] sm:$0xff] %v752_v3  ;;  %v747_v5 = vadd.f32 %v784_v1, %v746_v4 }
 0x3bb   :  { %756 = vst [vmem:[#allocation16 + $0x10] sm:$0xff] %v747_v5 }
 0x3bc   :  { %1285 = shalt.err (!%p1282_p2)
}
 0x3bd   :  { %769 = dma.vmem_to_hbm [thread:$0]  %s764_s0, 512, %s1478_s14, [#allocation4], %s1308_s18, %s1308_s18, %s1309_s19  }
 0x3be   :  { %1304 = dma.done.wait [#allocation4], 512  }
 0x3bf   :  { %1305 = vsyncadd [#allocation4], 4294966784 }
 0x3c0   :  { %773 = vsyncpa [#allocation3], 1 }
 0x3c1   :  { %774 = vsyncpa [#allocation6], 1 }
 0x3c2   :  { %775 = vsyncpa [#allocation9], 1 }
 0x3c3   :  { %776 = vsyncpa [#allocation12], 1 }
 0x3c4   :  { %777 = vsyncpa [#allocation15], 1 }
 0x3c5   :  { %778 = vsyncpa [#allocation4], 1 }

</bundles_post_ra>
